<compile_context>
chip_gen: v5e
topology: v5e:2x2
jax: 0.10.0
libtpu: 0.0.40
codegen_flags: <defaults>
</compile_context>

<pallas_src>
import jax
import jax.numpy as jnp
from jax.experimental import pallas as pl
from jax.experimental.pallas import tpu as pltpu


def attn_rnn_kernel(
    idx_ref,        # SMEM (b,)       int32 token ids
    emb_ref,        # VMEM (C, E)     embedding table
    h0_ref,         # VMEM (b, H)     previous hidden
    enc_ref,        # VMEM (b, t, E)  encoder features, batch-major
    wih_t_ref,      # VMEM (E, 3H)    GRU input weights (r|z|n), transposed
    whh_t_ref,      # VMEM (H, 3H)    GRU hidden weights (r|z|n), transposed
    b_gru_ref,      # VMEM (2, 3H)    [bih ; bhh]
    wgen_ref,       # VMEM (H, E)     general.weight (u = h_new @ Wgen)
    wreb_cat_ref,   # VMEM (E+H, H)   [Wgen.T @ Wr_att.T ; Wr_out.T]
    breb_ref,       # VMEM (1, H)     bgen @ Wr_att.T + breb
    wout_t_ref,     # VMEM (H, Cp)    out.weight.T, zero-padded to Cp lanes
    bout_ref,       # VMEM (1, Cp)    out.bias, -1e30 in padded lanes
    logp_ref,       # out  (b, Cp)
    hnew_ref,       # out  (b, H)
):
    f32 = jnp.float32
    b, H = h0_ref.shape

    # ---- embedding row gather (nn.Embedding; nn.Dropout is eval-mode identity) ----
    rows = [emb_ref[pl.ds(idx_ref[i], 1), :] for i in range(b)]
    x = jnp.concatenate(rows, axis=0)                               # (b, E)

    # ---- single-step GRU cell: 2 fused gate matmuls, PyTorch r/z/n order ----
    h = h0_ref[...]                                                 # (b, H)
    bg = b_gru_ref[...]                                             # (2, 3H)
    gi = jnp.dot(x, wih_t_ref[...], preferred_element_type=f32) + bg[0:1, :]
    gh = jnp.dot(h, whh_t_ref[...], preferred_element_type=f32) + bg[1:2, :]
    r = jax.nn.sigmoid(gi[:, 0:H] + gh[:, 0:H])
    z = jax.nn.sigmoid(gi[:, H:2 * H] + gh[:, H:2 * H])
    n = jnp.tanh(gi[:, 2 * H:3 * H] + r * gh[:, 2 * H:3 * H])
    h_new = (1.0 - z) * n + z * h                                   # (b, H)

    # ---- attention (the bgen . h_new score term is constant over t and
    #      cancels exactly in softmax, so it is dropped) ----
    enc = enc_ref[...]                                              # (b, t, E)
    u = jnp.dot(h_new, wgen_ref[...], preferred_element_type=f32)   # (b, E)
    # TODO(synk): for realistic t/E, compute scores/ctx as batched dot_general on the MXU.
    scores = jnp.sum(enc * u[:, None, :], axis=-1)                  # (b, t)
    m = jnp.max(scores, axis=-1, keepdims=True)
    e = jnp.exp(scores - m)
    w = e * pl.reciprocal(jnp.sum(e, axis=-1, keepdims=True), approx=True)
    ctx = jnp.sum(w[:, :, None] * enc, axis=1)                      # (b, E)

    # ---- reback(cat(attention, gru_out)) + relu; Wgen.T/bgen folded into the
    #      stacked reback matrix -> a single MXU matmul ----
    cat = jnp.concatenate([ctx, h_new], axis=1)                     # (b, E+H)
    reb = jnp.dot(cat, wreb_cat_ref[...], preferred_element_type=f32) + breb_ref[...]
    reb = jnp.maximum(reb, 0.0)                                     # (b, H)

    # ---- out projection (lane-dense Cp) + log_softmax ----
    logits = (jnp.dot(reb, wout_t_ref[...], preferred_element_type=f32)
              + bout_ref[...])                                      # (b, Cp)
    lm = jnp.max(logits, axis=-1, keepdims=True)
    lse = lm + jnp.log(jnp.sum(jnp.exp(logits - lm), axis=-1, keepdims=True))
    logp_ref[...] = logits - lse
    hnew_ref[...] = h_new


def init_params(key, hidden_size, embedding_size, class_num):
    ks = jax.random.split(key, 14)
    s = 0.1
    f32 = jnp.float32
    return {
        "emb":  jax.random.normal(ks[0], (class_num, embedding_size), f32) * s,
        "wih":  jax.random.normal(ks[1], (3 * hidden_size, embedding_size), f32) * s,
        "whh":  jax.random.normal(ks[2], (3 * hidden_size, hidden_size), f32) * s,
        "bih":  jax.random.normal(ks[3], (3 * hidden_size,), f32) * s,
        "bhh":  jax.random.normal(ks[4], (3 * hidden_size,), f32) * s,
        "wgen": jax.random.normal(ks[5], (hidden_size, embedding_size), f32) * s,
        "bgen": jax.random.normal(ks[6], (hidden_size,), f32) * s,
        "wreb": jax.random.normal(ks[7], (hidden_size, 2 * hidden_size), f32) * s,
        "breb": jax.random.normal(ks[8], (hidden_size,), f32) * s,
        "wout": jax.random.normal(ks[9], (class_num, hidden_size), f32) * s,
        "bout": jax.random.normal(ks[10], (class_num,), f32) * s,
    }


def decoder_forward(input_ids, hidden, encoder_outputs, params):
    f32 = jnp.float32
    wgen = params["wgen"].astype(f32)                     # (H, E)
    H, E = wgen.shape
    C = params["emb"].shape[0]
    b = input_ids.shape[0]
    Cp = max(128, ((C + 127) // 128) * 128)               # lane-dense output width

    # ---- one-time parameter glue (fusions / transposes / padding) ----
    wreb = params["wreb"].astype(f32)                     # (H, 2H)
    wr_att_t = wreb[:, 0:H].T                             # (H, H)
    wr_out_t = wreb[:, H:2 * H].T                         # (H, H)
    # attention = ctx @ Wgen.T + bgen folded into the reback matmul:
    wreb_cat = jnp.concatenate([wgen.T @ wr_att_t, wr_out_t], axis=0)    # (E+H, H)
    breb_eff = (params["bgen"].astype(f32) @ wr_att_t
                + params["breb"].astype(f32)).reshape(1, H)

    wout_t = jnp.zeros((H, Cp), f32).at[:, :C].set(params["wout"].astype(f32).T)
    bout_p = jnp.full((1, Cp), -1e30, f32).at[0, :C].set(params["bout"].astype(f32))

    args = (
        input_ids.astype(jnp.int32),                                # (b,)  -> SMEM
        params["emb"].astype(f32),                                  # (C, E)
        hidden[0].astype(f32),                                      # (b, H)
        jnp.transpose(encoder_outputs.astype(f32), (1, 0, 2)),      # (b, t, E)
        params["wih"].astype(f32).T,                                # (E, 3H)
        params["whh"].astype(f32).T,                                # (H, 3H)
        jnp.stack([params["bih"], params["bhh"]], 0).astype(f32),   # (2, 3H)
        wgen,                                                       # (H, E)
        wreb_cat, breb_eff,                                         # (E+H, H), (1, H)
        wout_t, bout_p,                                             # (H, Cp), (1, Cp)
    )

    smem = pl.BlockSpec(memory_space=pltpu.MemorySpace.SMEM)
    vmem = pl.BlockSpec(memory_space=pltpu.MemorySpace.VMEM)
    logp_p, h_new = pl.pallas_call(
        attn_rnn_kernel,
        out_shape=(jax.ShapeDtypeStruct((b, Cp), f32),
                   jax.ShapeDtypeStruct((b, H), f32)),
        in_specs=[smem] + [vmem] * (len(args) - 1),
        out_specs=(vmem, vmem),
    )(*args)
    return logp_p[:, :C], h_new[None, :, :]


def reference_forward(input_ids, hidden, enc, p):
    # Pure-JAX mirror of the PyTorch forward, for correctness checking.
    H = p["wgen"].shape[0]
    x = p["emb"][input_ids]
    h = hidden[0]
    gi = x @ p["wih"].T + p["bih"]
    gh = h @ p["whh"].T + p["bhh"]
    r = jax.nn.sigmoid(gi[:, :H] + gh[:, :H])
    z = jax.nn.sigmoid(gi[:, H:2 * H] + gh[:, H:2 * H])
    n = jnp.tanh(gi[:, 2 * H:] + r * gh[:, 2 * H:])
    h_new = (1.0 - z) * n + z * h
    t, b, c = enc.shape
    att = (enc.reshape(t * b, c) @ p["wgen"].T + p["bgen"]).reshape(t, b, H)
    att = jnp.transpose(att, (1, 0, 2))                          # (b, t, H)
    score = jnp.einsum("bth,bh->bt", att, h_new)
    w = jax.nn.softmax(score, axis=1)
    attention = jnp.einsum("bt,bth->bh", w, att)
    cat = jnp.concatenate([attention, h_new], axis=1)
    reb = jax.nn.relu(cat @ p["wreb"].T + p["breb"])
    logits = reb @ p["wout"].T + p["bout"]
    return jax.nn.log_softmax(logits, axis=1), h_new[None]


if __name__ == "__main__":
    H, E, C = 32, 32, 40      # hidden_size, embedding_size, class_num
    b, t = 2, 8               # batch, encoder sequence length

    key = jax.random.PRNGKey(0)
    kp, k1, k2, k3 = jax.random.split(key, 4)
    params = init_params(kp, H, E, C)

    input_ids = jax.random.randint(k1, (b,), 0, C, dtype=jnp.int32)
    hidden = jax.random.normal(k2, (1, b, H), jnp.float32)
    encoder_outputs = jax.random.normal(k3, (t, b, E), jnp.float32)

    fwd = jax.jit(decoder_forward)
    logp, h_new = fwd(input_ids, hidden, encoder_outputs, params)
    jax.block_until_ready((logp, h_new))

    ref_logp, ref_h = reference_forward(input_ids, hidden, encoder_outputs, params)
    assert logp.shape == (b, C) and h_new.shape == (1, b, H)
    # logp tolerance slightly loosened: approx-EUP reciprocal in the attention
    # softmax + algebraic weight folding (still far below any math error).
    assert jnp.allclose(logp, ref_logp, atol=1e-3, rtol=1e-3)
    assert jnp.allclose(h_new, ref_h, atol=1e-5, rtol=1e-5)
    print("KERNEL_OK")
</pallas_src>

<mosaic_0001>
module attributes {stable_mosaic.version = 11 : i64} {
  func.func @attn_rnn_kernel(%arg0: memref<2xi32, #tpu.memory_space<smem>>, %arg1: memref<40x32xf32, #tpu.memory_space<vmem>>, %arg2: memref<2x32xf32, #tpu.memory_space<vmem>>, %arg3: memref<2x8x32xf32, #tpu.memory_space<vmem>>, %arg4: memref<32x96xf32, #tpu.memory_space<vmem>>, %arg5: memref<32x96xf32, #tpu.memory_space<vmem>>, %arg6: memref<2x96xf32, #tpu.memory_space<vmem>>, %arg7: memref<32x32xf32, #tpu.memory_space<vmem>>, %arg8: memref<64x32xf32, #tpu.memory_space<vmem>>, %arg9: memref<1x32xf32, #tpu.memory_space<vmem>>, %arg10: memref<32x128xf32, #tpu.memory_space<vmem>>, %arg11: memref<1x128xf32, #tpu.memory_space<vmem>>, %arg12: memref<2x128xf32, #tpu.memory_space<vmem>>, %arg13: memref<2x32xf32, #tpu.memory_space<vmem>>) attributes {dimension_semantics = [], scalar_prefetch = 0 : i64, scratch_operands = 0 : i64, tpu.core_type = #tpu.core_type<tc>} {
    %c0 = arith.constant 0 : index
    %0 = memref.load %arg0[%c0] : memref<2xi32, #tpu.memory_space<smem>>
    %1 = arith.index_cast %0 : i32 to index
    %c0_0 = arith.constant 0 : index
    %2 = vector.load %arg1[%1, %c0_0] : memref<40x32xf32, #tpu.memory_space<vmem>>, vector<1x32xf32>
    %c1 = arith.constant 1 : index
    %3 = memref.load %arg0[%c1] : memref<2xi32, #tpu.memory_space<smem>>
    %4 = arith.index_cast %3 : i32 to index
    %c0_1 = arith.constant 0 : index
    %5 = vector.load %arg1[%4, %c0_1] : memref<40x32xf32, #tpu.memory_space<vmem>>, vector<1x32xf32>
    %6 = tpu.concatenate %2, %5 in 0 : vector<1x32xf32>, vector<1x32xf32> -> vector<2x32xf32>
    %c0_2 = arith.constant 0 : index
    %c0_3 = arith.constant 0 : index
    %7 = vector.load %arg2[%c0_2, %c0_3] : memref<2x32xf32, #tpu.memory_space<vmem>>, vector<2x32xf32>
    %c0_4 = arith.constant 0 : index
    %c0_5 = arith.constant 0 : index
    %8 = vector.load %arg6[%c0_4, %c0_5] : memref<2x96xf32, #tpu.memory_space<vmem>>, vector<2x96xf32>
    %c0_6 = arith.constant 0 : index
    %c0_7 = arith.constant 0 : index
    %9 = vector.load %arg4[%c0_6, %c0_7] : memref<32x96xf32, #tpu.memory_space<vmem>>, vector<32x96xf32>
    %cst = arith.constant dense<0.000000e+00> : vector<2x96xf32>
    %10 = tpu.matmul %6, %9, %cst {dimension_numbers = #tpu.dot_dimension_numbers<[1], [0], [0], [1], [0, 0, 1, 1], [], []>} : vector<2x32xf32>, vector<32x96xf32>, vector<2x96xf32> -> vector<2x96xf32>
    %11 = vector.extract_strided_slice %8 {offsets = [0, 0], sizes = [1, 96], strides = [1, 1]} : vector<2x96xf32> to vector<1x96xf32>
    %12 = vector.broadcast %11 : vector<1x96xf32> to vector<2x96xf32>
    %13 = arith.addf %10, %12 : vector<2x96xf32>
    %c0_8 = arith.constant 0 : index
    %c0_9 = arith.constant 0 : index
    %14 = vector.load %arg5[%c0_8, %c0_9] : memref<32x96xf32, #tpu.memory_space<vmem>>, vector<32x96xf32>
    %cst_10 = arith.constant dense<0.000000e+00> : vector<2x96xf32>
    %15 = tpu.matmul %7, %14, %cst_10 {dimension_numbers = #tpu.dot_dimension_numbers<[1], [0], [0], [1], [0, 0, 1, 1], [], []>} : vector<2x32xf32>, vector<32x96xf32>, vector<2x96xf32> -> vector<2x96xf32>
    %16 = vector.extract_strided_slice %8 {offsets = [1, 0], sizes = [1, 96], strides = [1, 1]} : vector<2x96xf32> to vector<1x96xf32>
    %17 = vector.broadcast %16 : vector<1x96xf32> to vector<2x96xf32>
    %18 = arith.addf %15, %17 : vector<2x96xf32>
    %19 = vector.extract_strided_slice %13 {offsets = [0, 0], sizes = [2, 32], strides = [1, 1]} : vector<2x96xf32> to vector<2x32xf32>
    %20 = vector.extract_strided_slice %18 {offsets = [0, 0], sizes = [2, 32], strides = [1, 1]} : vector<2x96xf32> to vector<2x32xf32>
    %21 = arith.addf %19, %20 : vector<2x32xf32>
    %22 = arith.negf %21 : vector<2x32xf32>
    %23 = math.exp %22 : vector<2x32xf32>
    %cst_11 = arith.constant 1.000000e+00 : f32
    %24 = vector.broadcast %cst_11 : f32 to vector<2x32xf32>
    %25 = arith.addf %24, %23 : vector<2x32xf32>
    %26 = arith.divf %24, %25 : vector<2x32xf32>
    %27 = vector.extract_strided_slice %13 {offsets = [0, 32], sizes = [2, 32], strides = [1, 1]} : vector<2x96xf32> to vector<2x32xf32>
    %28 = vector.extract_strided_slice %18 {offsets = [0, 32], sizes = [2, 32], strides = [1, 1]} : vector<2x96xf32> to vector<2x32xf32>
    %29 = arith.addf %27, %28 : vector<2x32xf32>
    %30 = arith.negf %29 : vector<2x32xf32>
    %31 = math.exp %30 : vector<2x32xf32>
    %cst_12 = arith.constant 1.000000e+00 : f32
    %32 = vector.broadcast %cst_12 : f32 to vector<2x32xf32>
    %33 = arith.addf %32, %31 : vector<2x32xf32>
    %34 = arith.divf %32, %33 : vector<2x32xf32>
    %35 = vector.extract_strided_slice %13 {offsets = [0, 64], sizes = [2, 32], strides = [1, 1]} : vector<2x96xf32> to vector<2x32xf32>
    %36 = vector.extract_strided_slice %18 {offsets = [0, 64], sizes = [2, 32], strides = [1, 1]} : vector<2x96xf32> to vector<2x32xf32>
    %37 = arith.mulf %26, %36 : vector<2x32xf32>
    %38 = arith.addf %35, %37 : vector<2x32xf32>
    %39 = math.tanh %38 : vector<2x32xf32>
    %cst_13 = arith.constant 1.000000e+00 : f32
    %40 = vector.broadcast %cst_13 : f32 to vector<2x32xf32>
    %41 = arith.subf %40, %34 : vector<2x32xf32>
    %42 = arith.mulf %41, %39 : vector<2x32xf32>
    %43 = arith.mulf %34, %7 : vector<2x32xf32>
    %44 = arith.addf %42, %43 : vector<2x32xf32>
    %c0_14 = arith.constant 0 : index
    %c0_15 = arith.constant 0 : index
    %c0_16 = arith.constant 0 : index
    %45 = vector.load %arg3[%c0_14, %c0_15, %c0_16] : memref<2x8x32xf32, #tpu.memory_space<vmem>>, vector<2x8x32xf32>
    %c0_17 = arith.constant 0 : index
    %c0_18 = arith.constant 0 : index
    %46 = vector.load %arg7[%c0_17, %c0_18] : memref<32x32xf32, #tpu.memory_space<vmem>>, vector<32x32xf32>
    %cst_19 = arith.constant dense<0.000000e+00> : vector<2x32xf32>
    %47 = tpu.matmul %44, %46, %cst_19 {dimension_numbers = #tpu.dot_dimension_numbers<[1], [0], [0], [1], [0, 0, 1, 1], [], []>} : vector<2x32xf32>, vector<32x32xf32>, vector<2x32xf32> -> vector<2x32xf32>
    %48 = vector.shape_cast %47 : vector<2x32xf32> to vector<2x1x32xf32>
    %49 = vector.broadcast %48 : vector<2x1x32xf32> to vector<2x8x32xf32>
    %50 = arith.mulf %45, %49 : vector<2x8x32xf32>
    %cst_20 = arith.constant dense<0.000000e+00> : vector<2x8xf32>
    %51 = vector.multi_reduction <add>, %50, %cst_20 [2] : vector<2x8x32xf32> to vector<2x8xf32>
    %cst_21 = arith.constant dense<0xFF800000> : vector<2xf32>
    %52 = vector.multi_reduction <maximumf>, %51, %cst_21 [1] : vector<2x8xf32> to vector<2xf32>
    %53 = vector.shape_cast %52 : vector<2xf32> to vector<2x1xf32>
    %54 = vector.broadcast %53 : vector<2x1xf32> to vector<2x8xf32>
    %55 = arith.subf %51, %54 : vector<2x8xf32>
    %56 = math.exp %55 : vector<2x8xf32>
    %cst_22 = arith.constant dense<0.000000e+00> : vector<2xf32>
    %57 = vector.multi_reduction <add>, %56, %cst_22 [1] : vector<2x8xf32> to vector<2xf32>
    %58 = vector.shape_cast %57 : vector<2xf32> to vector<2x1xf32>
    %59 = tpu.reciprocal %58 {approx = true} : vector<2x1xf32> -> vector<2x1xf32>
    %60 = vector.broadcast %59 : vector<2x1xf32> to vector<2x8xf32>
    %61 = arith.mulf %56, %60 : vector<2x8xf32>
    %62 = vector.shape_cast %61 : vector<2x8xf32> to vector<2x8x1xf32>
    %63 = vector.broadcast %62 : vector<2x8x1xf32> to vector<2x8x32xf32>
    %64 = arith.mulf %63, %45 : vector<2x8x32xf32>
    %cst_23 = arith.constant dense<0.000000e+00> : vector<2x32xf32>
    %65 = vector.multi_reduction <add>, %64, %cst_23 [1] : vector<2x8x32xf32> to vector<2x32xf32>
    %66 = tpu.concatenate %65, %44 in 1 : vector<2x32xf32>, vector<2x32xf32> -> vector<2x64xf32>
    %c0_24 = arith.constant 0 : index
    %c0_25 = arith.constant 0 : index
    %67 = vector.load %arg8[%c0_24, %c0_25] : memref<64x32xf32, #tpu.memory_space<vmem>>, vector<64x32xf32>
    %cst_26 = arith.constant dense<0.000000e+00> : vector<2x32xf32>
    %68 = tpu.matmul %66, %67, %cst_26 {dimension_numbers = #tpu.dot_dimension_numbers<[1], [0], [0], [1], [0, 0, 1, 1], [], []>} : vector<2x64xf32>, vector<64x32xf32>, vector<2x32xf32> -> vector<2x32xf32>
    %c0_27 = arith.constant 0 : index
    %c0_28 = arith.constant 0 : index
    %69 = vector.load %arg9[%c0_27, %c0_28] : memref<1x32xf32, #tpu.memory_space<vmem>>, vector<1x32xf32>
    %70 = vector.broadcast %69 : vector<1x32xf32> to vector<2x32xf32>
    %71 = arith.addf %68, %70 : vector<2x32xf32>
    %cst_29 = arith.constant 0.000000e+00 : f32
    %72 = vector.broadcast %cst_29 : f32 to vector<2x32xf32>
    %73 = arith.maximumf %71, %72 : vector<2x32xf32>
    %c0_30 = arith.constant 0 : index
    %c0_31 = arith.constant 0 : index
    %74 = vector.load %arg10[%c0_30, %c0_31] : memref<32x128xf32, #tpu.memory_space<vmem>>, vector<32x128xf32>
    %cst_32 = arith.constant dense<0.000000e+00> : vector<2x128xf32>
    %75 = tpu.matmul %73, %74, %cst_32 {dimension_numbers = #tpu.dot_dimension_numbers<[1], [0], [0], [1], [0, 0, 1, 1], [], []>} : vector<2x32xf32>, vector<32x128xf32>, vector<2x128xf32> -> vector<2x128xf32>
    %c0_33 = arith.constant 0 : index
    %c0_34 = arith.constant 0 : index
    %76 = vector.load %arg11[%c0_33, %c0_34] : memref<1x128xf32, #tpu.memory_space<vmem>>, vector<1x128xf32>
    %77 = vector.broadcast %76 : vector<1x128xf32> to vector<2x128xf32>
    %78 = arith.addf %75, %77 : vector<2x128xf32>
    %cst_35 = arith.constant dense<0xFF800000> : vector<2xf32>
    %79 = vector.multi_reduction <maximumf>, %78, %cst_35 [1] : vector<2x128xf32> to vector<2xf32>
    %80 = vector.shape_cast %79 : vector<2xf32> to vector<2x1xf32>
    %81 = vector.broadcast %80 : vector<2x1xf32> to vector<2x128xf32>
    %82 = arith.subf %78, %81 : vector<2x128xf32>
    %83 = math.exp %82 : vector<2x128xf32>
    %cst_36 = arith.constant dense<0.000000e+00> : vector<2xf32>
    %84 = vector.multi_reduction <add>, %83, %cst_36 [1] : vector<2x128xf32> to vector<2xf32>
    %85 = vector.shape_cast %84 : vector<2xf32> to vector<2x1xf32>
    %86 = math.log %85 : vector<2x1xf32>
    %87 = arith.addf %80, %86 : vector<2x1xf32>
    %88 = vector.broadcast %87 : vector<2x1xf32> to vector<2x128xf32>
    %89 = arith.subf %78, %88 : vector<2x128xf32>
    %c0_37 = arith.constant 0 : index
    %c0_38 = arith.constant 0 : index
    %90 = vector.load %arg12[%c0_37, %c0_38] : memref<2x128xf32, #tpu.memory_space<vmem>>, vector<2x128xf32>
    tpu.vector_store %arg12[%c0_37, %c0_38], %89 {strides = array<i32>} : memref<2x128xf32, #tpu.memory_space<vmem>>, vector<2x128xf32>,
    %c0_39 = arith.constant 0 : index
    %c0_40 = arith.constant 0 : index
    %91 = vector.load %arg13[%c0_39, %c0_40] : memref<2x32xf32, #tpu.memory_space<vmem>>, vector<2x32xf32>
    tpu.vector_store %arg13[%c0_39, %c0_40], %44 {strides = array<i32>} : memref<2x32xf32, #tpu.memory_space<vmem>>, vector<2x32xf32>,
    return
  }
}

</mosaic_0001>

<bundles_post_ra>
// kernel: decoder_forward.1
= control target key start
LH: loop header
LB: loop body
LE: loop exit
PB: predicated region body
PF: predicated region fallthrough
CT: control target
= control target key end

     0   :  { %19 = vsyncpa [#allocation4], 0  ;;  %s723_s0 = inlined_call_operand.vmem [shape: s32[2], index: 0, kind: input, shape index: {}]   ;;  %s724_s1 = inlined_call_operand.vmem [shape: f32[40,32], index: 1, kind: input, shape index: {}]   ;;  %s725_s2 = inlined_call_operand.vmem [shape: f32[2,32], index: 2, kind: input, shape index: {}]   ;;  %s726_s3 = inlined_call_operand.vmem [shape: f32[2,8,32], index: 3, kind: input, shape index: {}]   ;;  %s727_s4 = inlined_call_operand.vmem [shape: f32[32,96], index: 4, kind: input, shape index: {}]   ;;  %s728_s5 = inlined_call_operand.vmem [shape: f32[32,96], index: 5, kind: input, shape index: {}]   ;;  %s729_s6 = inlined_call_operand.vmem [shape: f32[2,96], index: 6, kind: input, shape index: {}]   ;;  %s730_s7 = inlined_call_operand.vmem [shape: f32[32,32], index: 7, kind: input, shape index: {}]   ;;  %s731_s8 = inlined_call_operand.vmem [shape: f32[64,32], index: 8, kind: input, shape index: {}]   ;;  %s732_s9 = inlined_call_operand.vmem [shape: f32[1,32], index: 9, kind: input, shape index: {}]   ;;  %s733_s10 = inlined_call_operand.vmem [shape: f32[32,128], index: 10, kind: input, shape index: {}]   ;;  %s734_s11 = inlined_call_operand.vmem [shape: f32[1,128], index: 11, kind: input, shape index: {}]   ;;  %s735_s12 = inlined_call_operand.hbm [shape: f32[2,128], index: 12, kind: output, shape index: {0}]   ;;  %s736_s13 = inlined_call_operand.hbm [shape: f32[2,32], index: 13, kind: output, shape index: {1}]  }
   0x1   :  { %20 = vsyncpa [#allocation3], 0 }
   0x2   :  { %21 = vsyncpa [#allocation7], 0  ;;  %s27_s27 = sshll.u32 %s723_s0, 4  ;;  %s515_s28 = smov [#allocation2]   ;;  %s28_s27 = int_to_ptr.vmem [resolvable:$true] %s27_s27 }
   0x3   :  { %30 = dma.vmem_to_smem %s28_s27, 16, %s515_s28, [#allocation4]  }
   0x4   :  { %509 = dma.done.wait [#allocation4], 16  }
   0x5   :  { %510 = vsyncadd [#allocation4], 4294967280 }
   0x6   :  { %57 = sfence }
   0x7   :  { %v103_v0 = vld [vmem:[%s728_s5 + $0x18] sm:$0xff]  ;;  %v102_v1 = vld [vmem:[%s728_s5 + $0x10] sm:$0xff]  ;;  %s58_s18 = sld [smem:[#allocation2]]  ;;  %v101_v4 = vld [vmem:[%s728_s5 + $0x8] sm:$0xff]  ;;  %vm76_vm0 = vcmask 261120   ;;  %vm67_vm1 = vcmask 1040384   ;;  %v217_v60 = vlaneseq }
   0x8   :  { %v74_v2 = vld [vmem:[%s727_s4 + $0x18] sm:$0xff]  ;;  %120 = vmatpush.msra.mxu1 %v103_v0  ;;  %v73_v3 = vld [vmem:[%s727_s4 + $0x10] sm:$0xff]  ;;  %s414_s20 = sld [smem:[#allocation2 + $0x1]]  ;;  %v72_v5 = vld [vmem:[%s727_s4 + $0x8] sm:$0xff]  ;;  %vm377_vm6 = vcmask 254976   ;;  %vm221_vm7 = vcmask 1041409  }
   0x9   :  { %92 = vmatpush.msra.mxu0 %v74_v2  ;;  %v100_v6 = vld [vmem:[%s728_s5] sm:$0xff]  ;;  %v175_v39 = vld [vmem:[%s730_s7 + $0x18] sm:$0xff]  ;;  %v174_v40 = vld [vmem:[%s730_s7 + $0x10] sm:$0xff]  ;;  %v218_v61 = vand.u32 127, %v217_v60  ;;  %vm224_vm8 = vcmask 58368   ;;  %vm305_vm9 = vcmask 523264  }
   0xa   :  { %121 = vmatpush.msra.mxu1 %v102_v1  ;;  %v71_v7 = vld [vmem:[%s727_s4] sm:$0xff]  ;;  %193 = vmatpush.msra.mxu2 %v175_v39  ;;  %v173_v41 = vld [vmem:[%s730_s7 + $0x8] sm:$0xff]  ;;  %vm361_vm10 = vcmask 1041408  }
   0xb   :  { %93 = vmatpush.msra.mxu0 %v73_v3  ;;  %v69_v8 = vld [vmem:[%s725_s2] sm:$0x3]  ;;  %v657_v54 = vld [vmem:[%s726_s3 + $0x8] sm:$0xff]  ;;  %s386_s2 = sshll.u32 %s735_s12, 4  ;;  %s387_s2 = int_to_ptr.hbm [resolvable:$true] %s386_s2 }
   0xc   :  { %122 = vmatpush.msra.mxu1 %v101_v4  ;;  %v70_v13 = vld [vmem:[%s729_s6] sm:$0x3]  ;;  %s518_s6 = smov 32   ;;  %194 = vmatpush.msra.mxu2 %v174_v40  ;;  %v519_v4 = vmov 0  }
   0xd   :  { %94 = vmatpush.msra.mxu0 %v72_v5  ;;  %s59_s16 = scalar_lea.vmem %s724_s1, %s58_s18  ;;  %v104_v14 = vperm.slane %v70_v13, 1  ;;  %s516_s18 = smov 64   ;;  %v75_v17 = vperm.slane %v70_v13, 0  ;;  %v172_v42 = vld [vmem:[%s730_s7] sm:$0xff]  ;;  %429 = vset.pattern.permute.xlu0 %v519_v4 }
   0xe   :  { %123 = vmatpush.msra.mxu1 %v100_v6  ;;  %s62_s5 = scalar_lea.vmem %s724_s1, %s414_s20  ;;  %v60_v9 = vld [vmem:[%s59_s16] sm:$0x1]  ;;  %s517_s1 = smov 96   ;;  %195 = vmatpush.msra.mxu2 %v173_v41 }
   0xf   :  { %95 = vmatpush.msra.mxu0 %v71_v7  ;;  %416 = vmatmul.msk.f32.vlgmr.msra.gmra.mxu1 %vm76_vm0, %v69_v8  ;;  %v63_v10 = vld [vmem:[%s62_s5] sm:$0x1]  ;;  %s397_s16 = sshll.u32 %s736_s13, 4  ;;  %s398_s16 = int_to_ptr.hbm [resolvable:$true] %s397_s16 }
  0x10   :  { %v65_v11 = vrot.slane %v63_v10, 7  ;;  %196 = vmatpush.msra.mxu2 %v172_v42  ;;  %v652_v51 = vld [vmem:[%s726_s3] sm:$0xff]  ;;  %428 = vset.pattern.permute.xlu2 %v519_v4 }
  0x11   :  { %430 = vset.pattern.permute.xlu1 %v519_v4 }
  0x12   :  { %v68_v12 = vsel %vm67_vm1, %v60_v9, %v65_v11 }
  0x13   :  { %415 = vmatmul.msk.f32.vlgmr.msra.gmra.mxu0 %vm76_vm0, %v68_v12 }
  0x8c   :  { %v125_v15 = vpop.f32.mrf.mxu1 }
  0x8d   :  { %v126_v16 = vadd.f32 %v125_v15, %v104_v14 }
  0x8f   :  { %149 = vrot.lane.b32.xlu0 %v126_v16, %s516_s18 }
  0x90   :  { %v97_v18 = vpop.f32.mrf.mxu0 }
  0x91   :  { %v98_v19 = vadd.f32 %v97_v18, %v75_v17 }
  0x93   :  { %v128_v20 = vadd.f32 %v126_v16, %v98_v19 }
  0x95   :  { %v417_v21 = vmul.f32 -1.442695, %v128_v20 }
  0x97   :  { %433 = vpow2.f32 %v417_v21 }
  0x9d   :  { %v434_v22 = vpop.eup %433 }
  0x9e   :  { %v132_v23 = vadd.f32 1.0, %v434_v22 }
  0xa0   :  { %435 = vrcp.f32 %v132_v23  ;;  %v144_v29 = vand.u32 2147483648, %v132_v23  ;;  %vm138_vm3 = vweird.f32 %v132_v23  ;;  %v142_v30 = vand.u32 2147483647, %v132_v23 }
  0xa2   :  { %v145_v32 = vor.u32 1.1754944e-38, %v144_v29  ;;  %vm143_vm5 = vcmp.eq.f32.partialorder %v142_v30, 8.507059e+37  ;;  %v297_v29 = vld [vmem:[%s731_s8 + $0x20] sm:$0xff]  ;;  %v296_v30 = vld [vmem:[%s731_s8 + $0x18] sm:$0xff] }
  0xa6   :  { %v436_v24 = vpop.eup %435 }
  0xa7   :  { %v134_v25 = vmul.f32 %v436_v24, %v132_v23  ;;  %vm139_vm2 = vweird.f32 %v436_v24 }
  0xa8   :  { %vm140_vm4 = vmor %vm138_vm3, %vm139_vm2 }
  0xa9   :  { %v135_v26 = vsub.f32 1.0, %v134_v25 }
  0xab   :  { %v136_v27 = vmul.f32 %v436_v24, %v135_v26  ;;  %v300_v26 = vld [vmem:[%s731_s8 + $0x38] sm:$0xff] }
  0xac   :  { %317 = vmatpush.msra.mxu3 %v300_v26 }
  0xad   :  { %v137_v28 = vadd.f32 %v436_v24, %v136_v27  ;;  %v299_v27 = vld [vmem:[%s731_s8 + $0x30] sm:$0xff] }
  0xae   :  { %318 = vmatpush.msra.mxu3 %v299_v27 }
  0xaf   :  { %v141_v31 = vsel %vm140_vm4, %v436_v24, %v137_v28  ;;  %v298_v28 = vld [vmem:[%s731_s8 + $0x28] sm:$0xff] }
  0xb0   :  { %v146_v34 = vsel %vm143_vm5, %v145_v32, %v141_v31  ;;  %319 = vmatpush.msra.mxu3 %v298_v28  ;;  %v295_v31 = vld [vmem:[%s731_s8 + $0x10] sm:$0xff]  ;;  %v294_v32 = vld [vmem:[%s731_s8 + $0x8] sm:$0xff] }
  0xb1   :  { %v159_v44 = vsub.f32 1.0, %v146_v34 }
  0xb2   :  { %320 = vmatpush.msra.mxu3 %v297_v29 }
  0xb4   :  { %321 = vmatpush.msra.mxu3 %v296_v30 }
  0xb6   :  { %322 = vmatpush.msra.mxu3 %v295_v31 }
  0xb8   :  { %323 = vmatpush.msra.mxu3 %v294_v32 }
 0x101   :  { %v150_v33 = vpop.permute.xlu0 %149 }
 0x102   :  { %v152_v35 = vmul.f32 %v150_v33, %v146_v34  ;;  %v293_v33 = vld [vmem:[%s731_s8] sm:$0xff] }
 0x103   :  { %324 = vmatpush.msra.mxu3 %v293_v33 }
 0x104   :  { %154 = vrot.lane.b32.xlu0 %v152_v35, %s516_s18  ;;  %v333_v35 = vld [vmem:[%s733_s10 + $0x18] sm:$0xff] }
 0x105   :  { %353 = vmatpush.msrb.mxu0 %v333_v35 }
 0x176   :  { %v155_v36 = vpop.permute.xlu0 %154 }
 0x177   :  { %v157_v37 = vadd.f32 %v155_v36, %v98_v19  ;;  %v332_v36 = vld [vmem:[%s733_s10 + $0x10] sm:$0xff] }
 0x178   :  { %354 = vmatpush.msrb.mxu0 %v332_v36 }
 0x179   :  { %437 = vtanh.f32 %v157_v37 }
 0x17f   :  { %v438_v38 = vpop.eup %437 }
 0x180   :  { %161 = vrot.lane.b32.xlu1 %v438_v38, %s517_s1 }
 0x188   :  { %165 = vrot.lane.b32.xlu1 %v69_v8, %s518_s6 }
 0x1f2   :  { %v162_v43 = vpop.permute.xlu1 %161 }
 0x1f3   :  { %v164_v46 = vmul.f32 %v162_v43, %v159_v44 }
 0x1fa   :  { %v166_v45 = vpop.permute.xlu1 %165 }
 0x1fb   :  { %v168_v47 = vmul.f32 %v166_v45, %v146_v34 }
 0x1fd   :  { %v645_v48 = vadd.f32 %v168_v47, %v164_v46 }
 0x1ff   :  { %177 = vrot.lane.b32.xlu2 %v645_v48, %s517_s1 }
 0x259   :  { %v178_v49 = vpop.permute.xlu2 %177 }
 0x25a   :  { %418 = vmatmul.msk.f32.vlgmr.msra.gmra.mxu2 %vm76_vm0, %v178_v49  ;;  %378 = vst.msk [vmem:[#allocation6] sm:$0x3] %vm377_vm6, %v178_v49 }
 0x2dd   :  { %v198_v50 = vpop.f32.mrf.mxu2 }
 0x2de   :  { %v202_v52 = vrot.slane %v198_v50, 1  ;;  %v203_v53 = vperm.slane %v198_v50, 0 }
 0x2e0   :  { %v204_v55 = vperm.slane %v202_v52, 0  ;;  %v207_v56 = vmul.f32 %v203_v53, %v652_v51 }
 0x2e2   :  { %v209_v57 = vsel %vm76_vm0, %v207_v56, 0.0  ;;  %v208_v58 = vmul.f32 %v204_v55, %v657_v54 }
 0x2e3   :  { %210 = vadd.xlane.f32.xlu2 %v209_v57 }
 0x2e4   :  { %v212_v59 = vsel %vm76_vm0, %v208_v58, 0.0  ;;  %v330_v58 = vld [vmem:[%s733_s10] sm:$0xff] }
 0x2e5   :  { %213 = vadd.xlane.f32.xlu0 %v212_v59  ;;  %v431_v59 = vld [vmem:[%s732_s9] ss:$0 sm:$0xff]  ;;  %s520_s9 = smov [#allocation6]  }
 0x356   :  { %v211_v62 = vpop.xlane.xlu2 %210 }
 0x357   :  { %v219_v0 = vperm.slane %v211_v62, %v218_v61 }
 0x358   :  { %v214_v63 = vpop.xlane.xlu0 %213 }
 0x359   :  { %v220_v1 = vperm.slane %v214_v63, %v218_v61 }
 0x35b   :  { %v222_v2 = vsel %vm221_vm7, %v220_v1, %v219_v0 }
 0x35c   :  { %v225_v3 = vsel %vm224_vm8, %v222_v2, -inf }
 0x35d   :  { %226 = vmax.xlane.f32.xlu1 %v225_v3 }
 0x3d0   :  { %v227_v5 = vpop.xlane.xlu1 %226 }
 0x3d1   :  { %v229_v6 = vperm.slane %v227_v5, 0  ;;  %v230_v7 = vperm.slane %v227_v5, 1 }
 0x3d3   :  { %v233_v8 = vsub.f32 %v211_v62, %v229_v6  ;;  %v234_v9 = vsub.f32 %v214_v63, %v230_v7 }
 0x3d5   :  { %v235_v10 = vmul.f32 1.442695, %v233_v8  ;;  %v237_v11 = vmul.f32 1.442695, %v234_v9 }
 0x3d7   :  { %439 = vpow2.f32 %v235_v10 }
 0x3d8   :  { %441 = vpow2.f32 %v237_v11 }
 0x3dd   :  { %v440_v12 = vpop.eup %439 }
 0x3de   :  { %v442_v13 = vpop.eup %441  ;;  %242 = vperm.xlu2 %428, %v440_v12  }
 0x3df   :  { %245 = vperm.xlu0 %429, %v442_v13  }
 0x438   :  { %v243_v14 = vpop.permute.xlu2 %242 }
 0x439   :  { %v247_v16 = vperm.slane %v243_v14, %v218_v61 }
 0x451   :  { %v246_v15 = vpop.permute.xlu0 %245 }
 0x452   :  { %v248_v17 = vperm.slane %v246_v15, %v218_v61 }
 0x454   :  { %v249_v18 = vsel %vm221_vm7, %v248_v17, %v247_v16 }
 0x455   :  { %v251_v19 = vsel %vm224_vm8, %v249_v18, 0.0 }
 0x456   :  { %252 = vadd.xlane.f32.xlu1 %v251_v19 }
 0x4c9   :  { %v253_v20 = vpop.xlane.xlu1 %252 }
 0x4ca   :  { %443 = vrcp.f32 %v253_v20 }
 0x4d0   :  { %v444_v21 = vpop.eup %443 }
 0x4d1   :  { %v257_v22 = vperm.slane %v444_v21, 1  ;;  %v256_v23 = vperm.slane %v444_v21, 0 }
 0x4d3   :  { %v261_v24 = vmul.f32 %v442_v13, %v257_v22  ;;  %v260_v25 = vmul.f32 %v440_v12, %v256_v23 }
 0x4d5   :  { %269 = vperm.xlu2 %428, %v261_v24   ;;  %264 = vperm.xlu1 %430, %v260_v25  }
 0x52f   :  { %v270_v34 = vpop.permute.xlu2 %269 }
 0x530   :  { %v273_v37 = vmul.f32 %v270_v34, %v657_v54 }
 0x532   :  { %v281_v38 = vsel %vm76_vm0, %v273_v37, 0.0 }
 0x533   :  { %v282_v39 = vrot.slane %v281_v38, 4 }
 0x535   :  { %v283_v40 = vadd.f32 %v282_v39, %v281_v38 }
 0x537   :  { %v284_v43 = vrot.slane %v283_v40, 2 }
 0x539   :  { %v285_v46 = vadd.f32 %v284_v43, %v283_v40 }
 0x53b   :  { %v286_v50 = vrot.slane %v285_v46, 1 }
 0x53d   :  { %v287_v54 = vadd.f32 %v286_v50, %v285_v46 }
 0x547   :  { %v265_v41 = vpop.permute.xlu1 %264 }
 0x548   :  { %v272_v42 = vmul.f32 %v265_v41, %v652_v51  ;;  %v331_v51 = vld [vmem:[%s733_s10 + $0x8] sm:$0xff]  ;;  %s395_s10 = sshll.u32 %s520_s9, 4  ;;  %s396_s10 = int_to_ptr.vmem [resolvable:$true] %s395_s10 }
 0x549   :  { %355 = vmatpush.msrb.mxu0 %v331_v51  ;;  %400 = dma.vmem_to_hbm [thread:$0]  %s396_s10, 32, %s398_s16, [#allocation7]  }
 0x54a   :  { %v274_v44 = vsel %vm76_vm0, %v272_v42, 0.0 }
 0x54b   :  { %v275_v45 = vrot.slane %v274_v44, 4  ;;  %356 = vmatpush.msrb.mxu0 %v330_v58 }
 0x54d   :  { %v276_v47 = vadd.f32 %v275_v45, %v274_v44 }
 0x54f   :  { %v277_v49 = vrot.slane %v276_v47, 2 }
 0x551   :  { %v278_v52 = vadd.f32 %v277_v49, %v276_v47 }
 0x553   :  { %v279_v53 = vrot.slane %v278_v52, 1 }
 0x555   :  { %v280_v55 = vadd.f32 %v279_v53, %v278_v52 }
 0x557   :  { %v290_v56 = vsel %vm221_vm7, %v287_v54, %v280_v55 }
 0x558   :  { %v292_v57 = vsel %vm76_vm0, %v290_v56, %v645_v48  ;;  %v432_v48 = vld [vmem:[%s734_s11] ss:$0 sm:$0xff]  ;;  %s521_s11 = smov [#allocation5]  }
 0x559   :  { %419 = vmatmul.msk.f32.vlgmr.msra.gmra.mxu3 %vm305_vm9, %v292_v57  ;;  %s384_s17 = sshll.u32 %s521_s11, 4  ;;  %s385_s17 = int_to_ptr.vmem [resolvable:$true] %s384_s17 }
 0x5dc   :  { %v326_v60 = vpop.f32.mrf.mxu3 }
 0x5dd   :  { %v327_v61 = vadd.f32 %v431_v59, %v326_v60 }
 0x5df   :  { %v329_v62 = vmax.f32 %v327_v61, 0.0 }
 0x5e1   :  { %420 = vmatmul.msk.f32.vlgmr.msrb.gmra.mxu0 %vm76_vm0, %v329_v62 }
 0x65e   :  { %v358_v63 = vpop.f32.mrf.mxu0 }
 0x65f   :  { %v359_v0 = vadd.f32 %v432_v48, %v358_v63 }
 0x661   :  { %v362_v1 = vsel %vm361_vm10, %v359_v0, -inf }
 0x662   :  { %363 = vmax.xlane.f32.xlu2 %v362_v1 }
 0x6d5   :  { %v364_v2 = vpop.xlane.xlu2 %363 }
 0x6d6   :  { %v365_v3 = vsub.f32 %v359_v0, %v364_v2 }
 0x6d8   :  { %v366_v4 = vmul.f32 1.442695, %v365_v3 }
 0x6da   :  { %445 = vpow2.f32 %v366_v4 }
 0x6e0   :  { %v446_v5 = vpop.eup %445 }
 0x6e1   :  { %v368_v6 = vsel %vm361_vm10, %v446_v5, 0.0 }
 0x6e2   :  { %369 = vadd.xlane.f32.xlu1 %v368_v6 }
 0x755   :  { %v370_v7 = vpop.xlane.xlu1 %369 }
 0x756   :  { %447 = vlog2.f32 %v370_v7 }
 0x75c   :  { %v448_v8 = vpop.eup %447 }
 0x75d   :  { %v372_v9 = vmul.f32 0.6931472, %v448_v8 }
 0x75f   :  { %v373_v10 = vadd.f32 %v372_v9, %v364_v2 }
 0x761   :  { %v374_v11 = vsub.f32 %v359_v0, %v373_v10 }
 0x763   :  { %375 = vst [vmem:[#allocation5] sm:$0x3] %v374_v11 }
 0x764   :  { %389 = dma.vmem_to_hbm [thread:$0]  %s385_s17, 32, %s387_s2, [#allocation3]  }
 0x765   :  { %511 = dma.done.wait [#allocation3], 32  }
 0x766   :  { %512 = vsyncadd [#allocation3], 4294967264 }
 0x767   :  { %513 = dma.done.wait [#allocation7], 32  }
 0x768   :  { %514 = vsyncadd [#allocation7], 4294967264 }
 0x769   :  { %409 = vsyncpa [#allocation3], 1 }
 0x76a   :  { %410 = vsyncpa [#allocation7], 1 }
 0x76b   :  { %411 = vsyncpa [#allocation4], 1 }

</bundles_post_ra>
